<compile_context>
chip_gen: v6e
topology: v6e:2x2x1
jax: 0.10.0
libtpu: 0.0.40
codegen_flags: <defaults>
</compile_context>

<pallas_src>
import functools

import jax
import jax.numpy as jnp
from jax.experimental import pallas as pl
from jax.experimental.pallas import tpu as pltpu

# --- model config (small, consistent with the module's __init__) ---
B = 64          # batch
IN = 16         # input_size
K = 8           # k for ConcreteSelector -> mlp_input_size = k
H0, H1 = 32, 32 # hidden widths
OUT = 4         # output_size
TEMP = 0.5      # concrete selector temperature (fixed)
BN_EPS = 1e-5   # nn.BatchNorm1d default eps


def selector_mlp_kernel(x_ref, w0_ref, p0_ref, w1_ref, p1_ref, wo_ref, bo_ref,
                        y_ref, a_ref):
    x = x_ref[...]

    # hidden layer 0: (selector folded into W0_eff)  Linear -> ReLU -> folded-BN
    h = jnp.dot(x, w0_ref[...], preferred_element_type=jnp.float32)
    h = jnp.maximum(h + p0_ref[0:1, :], 0.0) * p0_ref[1:2, :] + p0_ref[2:3, :]

    # hidden layer 1: Linear -> ReLU -> folded-BN
    h = jnp.dot(h, w1_ref[...], preferred_element_type=jnp.float32)
    h = jnp.maximum(h + p1_ref[0:1, :], 0.0) * p1_ref[1:2, :] + p1_ref[2:3, :]

    a_ref[...] = h                                   # MLP stores last hidden as self.a

    # output layer, output_activation = None (identity)
    y_ref[...] = jnp.dot(h, wo_ref[...], preferred_element_type=jnp.float32) + bo_ref[...]


def prepare_params(params):
    """One-time parameter folding (selector softmax + eval-mode BatchNorm)."""
    (logits, w0, b0, g0, be0, rm0, rv0,
     w1, b1, g1, be1, rm1, rv1, wo, bo) = params

    m = jax.nn.softmax(logits / TEMP, axis=-1)                    # (K, IN)
    w0_eff = jnp.dot(m.T, w0)                                     # (IN, H0): x @ M.T @ W0

    s0 = g0 * jax.lax.rsqrt(rv0 + BN_EPS)
    p0 = jnp.concatenate([b0, s0, be0 - rm0 * s0], axis=0)        # (3, H0): [bias; scale; shift]
    s1 = g1 * jax.lax.rsqrt(rv1 + BN_EPS)
    p1 = jnp.concatenate([b1, s1, be1 - rm1 * s1], axis=0)        # (3, H1)

    return (w0_eff, p0, w1, p1, wo, bo)


@functools.partial(jax.jit)
def selector_mlp_forward(x, prepared):
    w0_eff, p0, w1, p1, wo, bo = prepared
    vmem = pl.BlockSpec(memory_space=pltpu.MemorySpace.VMEM)
    # Whole working set is <100 KiB -> single invocation, everything resident in VMEM.
    y, a = pl.pallas_call(
        selector_mlp_kernel,
        out_shape=(jax.ShapeDtypeStruct((B, OUT), jnp.float32),
                   jax.ShapeDtypeStruct((B, H1), jnp.float32)),
        in_specs=[vmem] * 7,
        out_specs=(vmem, vmem),
    )(x, w0_eff, p0, w1, p1, wo, bo)
    return y, a


def make_params(key):
    ks = jax.random.split(key, 8)
    f32 = jnp.float32
    logits = jax.random.normal(ks[0], (K, IN), f32)
    w0 = jax.random.normal(ks[1], (K, H0), f32) * 0.1
    b0 = jax.random.normal(ks[2], (1, H0), f32) * 0.1
    w1 = jax.random.normal(ks[3], (H0, H1), f32) * 0.1
    b1 = jax.random.normal(ks[4], (1, H1), f32) * 0.1
    wo = jax.random.normal(ks[5], (H1, OUT), f32) * 0.1
    bo = jax.random.normal(ks[6], (1, OUT), f32) * 0.1
    # BatchNorm1d parameters / running stats (deterministic, non-trivial)
    g0  = 1.0 + 0.1 * jax.random.normal(ks[7], (1, H0), f32)
    be0 = jnp.full((1, H0), 0.05, f32)
    rm0 = jnp.full((1, H0), 0.1, f32)
    rv0 = jnp.full((1, H0), 0.9, f32)
    g1  = jnp.ones((1, H1), f32)
    be1 = jnp.zeros((1, H1), f32)
    rm1 = jnp.full((1, H1), -0.1, f32)
    rv1 = jnp.full((1, H1), 1.1, f32)
    return (logits, w0, b0, g0, be0, rm0, rv0,
            w1, b1, g1, be1, rm1, rv1, wo, bo)


def reference_forward(x, params):
    """Unfused reference with the original module's eval-mode semantics."""
    (logits, w0, b0, g0, be0, rm0, rv0,
     w1, b1, g1, be1, rm1, rv1, wo, bo) = params
    m = jax.nn.softmax(logits / TEMP, axis=-1)
    h = x @ m.T
    h = jnp.maximum(h @ w0 + b0, 0.0)
    h = (h - rm0) / jnp.sqrt(rv0 + BN_EPS) * g0 + be0
    h = jnp.maximum(h @ w1 + b1, 0.0)
    h = (h - rm1) / jnp.sqrt(rv1 + BN_EPS) * g1 + be1
    return h @ wo + bo, h


if __name__ == "__main__":
    key = jax.random.PRNGKey(0)
    kx, kp = jax.random.split(key)
    x = jax.random.normal(kx, (B, IN), jnp.float32)
    params = make_params(kp)

    prepared = prepare_params(params)            # one-time folding (not per-call work)
    y, a = jax.block_until_ready(selector_mlp_forward(x, prepared))

    y_ref, a_ref = reference_forward(x, params)
    assert jnp.allclose(y, y_ref, atol=1e-4, rtol=1e-4)
    assert jnp.allclose(a, a_ref, atol=1e-4, rtol=1e-4)
    print("KERNEL_OK")
</pallas_src>

<mosaic_0001>
module attributes {stable_mosaic.version = 11 : i64} {
  func.func @selector_mlp_kernel(%arg0: memref<64x16xf32, #tpu.memory_space<vmem>>, %arg1: memref<16x32xf32, #tpu.memory_space<vmem>>, %arg2: memref<3x32xf32, #tpu.memory_space<vmem>>, %arg3: memref<32x32xf32, #tpu.memory_space<vmem>>, %arg4: memref<3x32xf32, #tpu.memory_space<vmem>>, %arg5: memref<32x4xf32, #tpu.memory_space<vmem>>, %arg6: memref<1x4xf32, #tpu.memory_space<vmem>>, %arg7: memref<64x4xf32, #tpu.memory_space<vmem>>, %arg8: memref<64x32xf32, #tpu.memory_space<vmem>>) attributes {dimension_semantics = [], scalar_prefetch = 0 : i64, scratch_operands = 0 : i64, tpu.core_type = #tpu.core_type<tc>} {
    %c0 = arith.constant 0 : index
    %c0_0 = arith.constant 0 : index
    %0 = vector.load %arg0[%c0, %c0_0] : memref<64x16xf32, #tpu.memory_space<vmem>>, vector<64x16xf32>
    %c0_1 = arith.constant 0 : index
    %c0_2 = arith.constant 0 : index
    %1 = vector.load %arg1[%c0_1, %c0_2] : memref<16x32xf32, #tpu.memory_space<vmem>>, vector<16x32xf32>
    %cst = arith.constant dense<0.000000e+00> : vector<64x32xf32>
    %2 = tpu.matmul %0, %1, %cst {dimension_numbers = #tpu.dot_dimension_numbers<[1], [0], [0], [1], [0, 0, 1, 1], [], []>} : vector<64x16xf32>, vector<16x32xf32>, vector<64x32xf32> -> vector<64x32xf32>
    %c0_3 = arith.constant 0 : index
    %c0_4 = arith.constant 0 : index
    %3 = vector.load %arg2[%c0_3, %c0_4] : memref<3x32xf32, #tpu.memory_space<vmem>>, vector<1x32xf32>
    %4 = vector.broadcast %3 : vector<1x32xf32> to vector<64x32xf32>
    %5 = arith.addf %2, %4 : vector<64x32xf32>
    %cst_5 = arith.constant 0.000000e+00 : f32
    %6 = vector.broadcast %cst_5 : f32 to vector<64x32xf32>
    %7 = arith.maximumf %5, %6 : vector<64x32xf32>
    %c1 = arith.constant 1 : index
    %c0_6 = arith.constant 0 : index
    %8 = vector.load %arg2[%c1, %c0_6] : memref<3x32xf32, #tpu.memory_space<vmem>>, vector<1x32xf32>
    %9 = vector.broadcast %8 : vector<1x32xf32> to vector<64x32xf32>
    %10 = arith.mulf %7, %9 : vector<64x32xf32>
    %c2 = arith.constant 2 : index
    %c0_7 = arith.constant 0 : index
    %11 = vector.load %arg2[%c2, %c0_7] : memref<3x32xf32, #tpu.memory_space<vmem>>, vector<1x32xf32>
    %12 = vector.broadcast %11 : vector<1x32xf32> to vector<64x32xf32>
    %13 = arith.addf %10, %12 : vector<64x32xf32>
    %c0_8 = arith.constant 0 : index
    %c0_9 = arith.constant 0 : index
    %14 = vector.load %arg3[%c0_8, %c0_9] : memref<32x32xf32, #tpu.memory_space<vmem>>, vector<32x32xf32>
    %cst_10 = arith.constant dense<0.000000e+00> : vector<64x32xf32>
    %15 = tpu.matmul %13, %14, %cst_10 {dimension_numbers = #tpu.dot_dimension_numbers<[1], [0], [0], [1], [0, 0, 1, 1], [], []>} : vector<64x32xf32>, vector<32x32xf32>, vector<64x32xf32> -> vector<64x32xf32>
    %c0_11 = arith.constant 0 : index
    %c0_12 = arith.constant 0 : index
    %16 = vector.load %arg4[%c0_11, %c0_12] : memref<3x32xf32, #tpu.memory_space<vmem>>, vector<1x32xf32>
    %17 = vector.broadcast %16 : vector<1x32xf32> to vector<64x32xf32>
    %18 = arith.addf %15, %17 : vector<64x32xf32>
    %cst_13 = arith.constant 0.000000e+00 : f32
    %19 = vector.broadcast %cst_13 : f32 to vector<64x32xf32>
    %20 = arith.maximumf %18, %19 : vector<64x32xf32>
    %c1_14 = arith.constant 1 : index
    %c0_15 = arith.constant 0 : index
    %21 = vector.load %arg4[%c1_14, %c0_15] : memref<3x32xf32, #tpu.memory_space<vmem>>, vector<1x32xf32>
    %22 = vector.broadcast %21 : vector<1x32xf32> to vector<64x32xf32>
    %23 = arith.mulf %20, %22 : vector<64x32xf32>
    %c2_16 = arith.constant 2 : index
    %c0_17 = arith.constant 0 : index
    %24 = vector.load %arg4[%c2_16, %c0_17] : memref<3x32xf32, #tpu.memory_space<vmem>>, vector<1x32xf32>
    %25 = vector.broadcast %24 : vector<1x32xf32> to vector<64x32xf32>
    %26 = arith.addf %23, %25 : vector<64x32xf32>
    %c0_18 = arith.constant 0 : index
    %c0_19 = arith.constant 0 : index
    %27 = vector.load %arg8[%c0_18, %c0_19] : memref<64x32xf32, #tpu.memory_space<vmem>>, vector<64x32xf32>
    tpu.vector_store %arg8[%c0_18, %c0_19], %26 {strides = array<i32>} : memref<64x32xf32, #tpu.memory_space<vmem>>, vector<64x32xf32>,
    %c0_20 = arith.constant 0 : index
    %c0_21 = arith.constant 0 : index
    %28 = vector.load %arg5[%c0_20, %c0_21] : memref<32x4xf32, #tpu.memory_space<vmem>>, vector<32x4xf32>
    %cst_22 = arith.constant dense<0.000000e+00> : vector<64x4xf32>
    %29 = tpu.matmul %26, %28, %cst_22 {dimension_numbers = #tpu.dot_dimension_numbers<[1], [0], [0], [1], [0, 0, 1, 1], [], []>} : vector<64x32xf32>, vector<32x4xf32>, vector<64x4xf32> -> vector<64x4xf32>
    %c0_23 = arith.constant 0 : index
    %c0_24 = arith.constant 0 : index
    %30 = vector.load %arg6[%c0_23, %c0_24] : memref<1x4xf32, #tpu.memory_space<vmem>>, vector<1x4xf32>
    %31 = vector.broadcast %30 : vector<1x4xf32> to vector<64x4xf32>
    %32 = arith.addf %29, %31 : vector<64x4xf32>
    %c0_25 = arith.constant 0 : index
    %c0_26 = arith.constant 0 : index
    %33 = vector.load %arg7[%c0_25, %c0_26] : memref<64x4xf32, #tpu.memory_space<vmem>>, vector<64x4xf32>
    tpu.vector_store %arg7[%c0_25, %c0_26], %32 {strides = array<i32>} : memref<64x4xf32, #tpu.memory_space<vmem>>, vector<64x4xf32>,
    return
  }
}

</mosaic_0001>

<bundles_post_ra>
// kernel: selector_mlp_forward.1
= control target key start
LH: loop header
LB: loop body
LE: loop exit
PB: predicated region body
PF: predicated region fallthrough
CT: control target
= control target key end

     0   :  { %vm43_vm0 = vcmask 130048   ;;  %vm216_vm1 = vcmask 261120   ;;  %vm528_vm2 = vcmask 31744   ;;  %s878_s1 = inlined_call_operand.vmem [shape: f32[16,32], index: 1, kind: input, shape index: {}]   ;;  %s879_s0 = inlined_call_operand.vmem [shape: f32[64,16], index: 0, kind: input, shape index: {}]   ;;  %s880_s3 = inlined_call_operand.vmem [shape: f32[32,32], index: 3, kind: input, shape index: {}]   ;;  %s881_s2 = inlined_call_operand.vmem [shape: f32[3,32], index: 2, kind: input, shape index: {}]   ;;  %s882_s5 = inlined_call_operand.vmem [shape: f32[32,4], index: 5, kind: input, shape index: {}]   ;;  %s883_s4 = inlined_call_operand.vmem [shape: f32[3,32], index: 4, kind: input, shape index: {}]   ;;  %s884_s8 = inlined_call_operand.vmem [shape: f32[64,32], index: 8, kind: output, shape index: {1}]   ;;  %s885_s6 = inlined_call_operand.vmem [shape: f32[1,4], index: 6, kind: input, shape index: {}]   ;;  %s886_s7 = inlined_call_operand.vmem [shape: f32[64,4], index: 7, kind: output, shape index: {0}]  }
   0x1   :  { %v37_v0 = vld [vmem:[%s878_s1 + $0x8] sm:$0xff]  ;;  %v36_v1 = vld [vmem:[%s878_s1] sm:$0xff]  ;;  %v30_v4 = vld [vmem:[%s879_s0 + $0x10] sm:$0xff] }
   0x2   :  { %v28_v2 = vld [vmem:[%s879_s0] sm:$0xff]  ;;  %610 = vmatprep.subr.mxu0 %v37_v0  ;;  %v29_v3 = vld [vmem:[%s879_s0 + $0x8] sm:$0xff]  ;;  %666 = vmatprep.subr.mxu1 %v37_v0  ;;  %v34_v7 = vld [vmem:[%s879_s0 + $0x30] sm:$0xff] }
   0x3   :  { %614 = vmatprep.mubr.msk.f32.mxu0 %vm43_vm0, %v28_v2  ;;  %611 = vmatpush3.msra.mxu0 %v37_v0  ;;  %v32_v5 = vld [vmem:[%s879_s0 + $0x20] sm:$0xff]  ;;  %v33_v6 = vld [vmem:[%s879_s0 + $0x28] sm:$0xff]  ;;  %v31_v8 = vld [vmem:[%s879_s0 + $0x18] sm:$0xff] }
   0x4   :  { %612 = vmatprep.subr.mxu0 %v36_v1  ;;  %668 = vmatpush3.msra.mxu1 %v37_v0  ;;  %v35_v9 = vld [vmem:[%s879_s0 + $0x38] sm:$0xff]  ;;  %v209_v11 = vld [vmem:[%s880_s3 + $0x10] sm:$0xff]  ;;  %v208_v12 = vld [vmem:[%s880_s3 + $0x8] sm:$0xff] }
   0x5   :  { %613 = vmatpush3.msra.mxu0 %v36_v1  ;;  %667 = vmatprep.subr.mxu1 %v36_v1  ;;  %v210_v10 = vld [vmem:[%s880_s3 + $0x18] sm:$0xff]  ;;  %v207_v13 = vld [vmem:[%s880_s3] sm:$0xff]  ;;  %v390_v58 = vld [vmem:[%s882_s5 + $0x10] sm:$0xff] }
   0x6   :  { %615 = vmatmul.mubr.msk.f32.vlgmr.msra.gmra.mxu0 %vm43_vm0, %v29_v3  ;;  %669 = vmatpush3.msra.mxu1 %v36_v1  ;;  %v545_v14 = vld [vmem:[%s881_s2] ss:$0 sm:$0xff]  ;;  %v554_v20 = vld [vmem:[%s881_s2 + $0x1] ss:$0 sm:$0xff]  ;;  %v555_v31 = vld [vmem:[%s881_s2 + $0x2] ss:$0 sm:$0xff] }
   0x7   :  { %617 = vmatprep.mubr.msk.f32.mxu0 %vm43_vm0, %v30_v4  ;;  %620 = vmatprep.mubr.msk.f32.mxu1 %vm43_vm0, %v32_v5  ;;  %v391_v57 = vld [vmem:[%s882_s5 + $0x18] sm:$0xff]  ;;  %v389_v59 = vld [vmem:[%s882_s5 + $0x8] sm:$0xff]  ;;  %v388_v60 = vld [vmem:[%s882_s5] sm:$0xff] }
   0x8   :  { %621 = vmatmul.mubr.msk.f32.vlgmr.msra.gmra.mxu1 %vm43_vm0, %v33_v6  ;;  %626 = vmatprep.subr.mxu1 %v210_v10  ;;  %v556_v61 = vld [vmem:[%s883_s4] ss:$0 sm:$0xff]  ;;  %v565_v0 = vld [vmem:[%s883_s4 + $0x1] ss:$0 sm:$0xff]  ;;  %v566_v4 = vld [vmem:[%s883_s4 + $0x2] ss:$0 sm:$0xff] }
   0x9   :  { %623 = vmatprep.mubr.msk.f32.mxu1 %vm43_vm0, %v34_v7  ;;  %627 = vmatpush3.msra.mxu1 %v210_v10 }
   0xa   :  { %618 = vmatmul.mubr.msk.f32.gmra.mxu0 %vm43_vm0, %v31_v8  ;;  %628 = vmatprep.subr.mxu1 %v209_v11 }
   0xb   :  { %629 = vmatpush3.msra.mxu1 %v209_v11  ;;  %646 = vmatprep.subr.mxu0 %v391_v57 }
   0xc   :  { %624 = vmatmul.mubr.msk.f32.gmra.mxu1 %vm43_vm0, %v35_v9  ;;  %630 = vmatprep.subr.mxu1 %v208_v12 }
   0xd   :  { %631 = vmatpush3.msra.mxu1 %v208_v12  ;;  %647 = vmatpush3.msra.mxu0 %v391_v57 }
   0xe   :  { %632 = vmatprep.subr.mxu1 %v207_v13  ;;  %648 = vmatprep.subr.mxu0 %v390_v58 }
   0xf   :  { %633 = vmatpush3.msra.mxu1 %v207_v13  ;;  %649 = vmatpush3.msra.mxu0 %v390_v58 }
  0x10   :  { %650 = vmatprep.subr.mxu0 %v389_v59 }
  0x11   :  { %651 = vmatpush3.msra.mxu0 %v389_v59 }
  0x12   :  { %652 = vmatprep.subr.mxu0 %v388_v60 }
  0x13   :  { %653 = vmatpush3.msra.mxu0 %v388_v60 }
  0xc6   :  { %v616_v15 = vpop.f32.mrf.mxu0 }
  0xc7   :  { %v140_v16 = vadd.f32 %v616_v15, %v545_v14 }
  0xc8   :  { %v134_v17 = vpop.f32.mrf.mxu0  ;;  %v622_v18 = vpop.f32.mrf.mxu1 }
  0xc9   :  { %v174_v19 = vmax.f32 %v140_v16, 0.0  ;;  %v135_v21 = vadd.f32 %v545_v14, %v134_v17  ;;  %v160_v26 = vadd.f32 %v622_v18, %v545_v14 }
  0xca   :  { %v619_v22 = vpop.f32.mrf.mxu0  ;;  %v154_v23 = vpop.f32.mrf.mxu1 }
  0xcb   :  { %v173_v24 = vmax.f32 %v135_v21, 0.0  ;;  %v150_v25 = vadd.f32 %v619_v22, %v545_v14  ;;  %v187_v27 = vmul.f32 %v554_v20, %v174_v19  ;;  %v155_v29 = vadd.f32 %v545_v14, %v154_v23 }
  0xcc   :  { %v144_v28 = vpop.f32.mrf.mxu0  ;;  %v625_v30 = vpop.f32.mrf.mxu1  ;;  %v178_v39 = vmax.f32 %v160_v26, 0.0 }
  0xcd   :  { %v186_v32 = vmul.f32 %v554_v20, %v173_v24  ;;  %v176_v33 = vmax.f32 %v150_v25, 0.0  ;;  %v145_v34 = vadd.f32 %v545_v14, %v144_v28  ;;  %v177_v35 = vmax.f32 %v155_v29, 0.0 }
  0xce   :  { %v164_v36 = vpop.f32.mrf.mxu1  ;;  %v200_v41 = vadd.f32 %v555_v31, %v187_v27  ;;  %v170_v44 = vadd.f32 %v625_v30, %v545_v14  ;;  %v191_v51 = vmul.f32 %v554_v20, %v178_v39 }
  0xcf   :  { %v199_v37 = vadd.f32 %v555_v31, %v186_v32  ;;  %v175_v38 = vmax.f32 %v145_v34, 0.0  ;;  %v165_v40 = vadd.f32 %v545_v14, %v164_v36  ;;  %v189_v42 = vmul.f32 %v554_v20, %v176_v33 }
  0xd0   :  { %v190_v43 = vmul.f32 %v554_v20, %v177_v35  ;;  %v180_v52 = vmax.f32 %v170_v44, 0.0  ;;  %v204_v54 = vadd.f32 %v555_v31, %v191_v51 }
  0xd1   :  { %v188_v45 = vmul.f32 %v554_v20, %v175_v38  ;;  %634 = vmatprep.mubr.msk.f32.mxu1 %vm216_vm1, %v199_v37  ;;  %v179_v46 = vmax.f32 %v165_v40, 0.0  ;;  %v202_v50 = vadd.f32 %v555_v31, %v189_v42  ;;  %v567_v40 = vld [vmem:[%s885_s6] ss:$0 sm:$0xff] }
  0xd2   :  { %635 = vmatmul.mubr.msk.f32.vlgmr.msra.gmra.mxu1 %vm216_vm1, %v200_v41  ;;  %v203_v48 = vadd.f32 %v555_v31, %v190_v43  ;;  %v193_v55 = vmul.f32 %v554_v20, %v180_v52 }
  0xd3   :  { %v201_v47 = vadd.f32 %v555_v31, %v188_v45  ;;  %v192_v49 = vmul.f32 %v554_v20, %v179_v46 }
  0xd4   :  { %v206_v56 = vadd.f32 %v555_v31, %v193_v55 }
  0xd5   :  { %637 = vmatprep.mubr.msk.f32.mxu1 %vm216_vm1, %v201_v47  ;;  %v205_v53 = vadd.f32 %v555_v31, %v192_v49 }
  0xd6   :  { %638 = vmatmul.mubr.msk.f32.gmra.mxu1 %vm216_vm1, %v202_v50 }
  0xd7   :  { %640 = vmatprep.mubr.msk.f32.mxu1 %vm216_vm1, %v203_v48 }
  0xda   :  { %641 = vmatmul.mubr.msk.f32.gmra.mxu1 %vm216_vm1, %v204_v54 }
  0xdb   :  { %643 = vmatprep.mubr.msk.f32.mxu1 %vm216_vm1, %v205_v53 }
  0xde   :  { %644 = vmatmul.mubr.msk.f32.gmra.mxu1 %vm216_vm1, %v206_v56 }
 0x192   :  { %v636_v62 = vpop.f32.mrf.mxu1 }
 0x193   :  { %v313_v63 = vadd.f32 %v636_v62, %v556_v61 }
 0x194   :  { %v307_v1 = vpop.f32.mrf.mxu1 }
 0x195   :  { %v347_v2 = vmax.f32 %v313_v63, 0.0  ;;  %v308_v3 = vadd.f32 %v556_v61, %v307_v1 }
 0x196   :  { %v639_v5 = vpop.f32.mrf.mxu1 }
 0x197   :  { %v360_v6 = vmul.f32 %v565_v0, %v347_v2  ;;  %v346_v7 = vmax.f32 %v308_v3, 0.0  ;;  %v323_v8 = vadd.f32 %v639_v5, %v556_v61 }
 0x198   :  { %v317_v9 = vpop.f32.mrf.mxu1 }
 0x199   :  { %v373_v10 = vadd.f32 %v566_v4, %v360_v6  ;;  %v359_v11 = vmul.f32 %v565_v0, %v346_v7  ;;  %v349_v12 = vmax.f32 %v323_v8, 0.0  ;;  %v318_v13 = vadd.f32 %v556_v61, %v317_v9 }
 0x19a   :  { %v642_v14 = vpop.f32.mrf.mxu1 }
 0x19b   :  { %381 = vst.msk [vmem:[%s884_s8 + $0x8] sm:$0xff] %vm216_vm1, %v373_v10  ;;  %v372_v15 = vadd.f32 %v566_v4, %v359_v11  ;;  %v362_v16 = vmul.f32 %v565_v0, %v349_v12  ;;  %v348_v17 = vmax.f32 %v318_v13, 0.0  ;;  %v333_v18 = vadd.f32 %v642_v14, %v556_v61 }
 0x19c   :  { %v327_v19 = vpop.f32.mrf.mxu1 }
 0x19d   :  { %380 = vst.msk [vmem:[%s884_s8] sm:$0xff] %vm216_vm1, %v372_v15  ;;  %v375_v20 = vadd.f32 %v566_v4, %v362_v16  ;;  %v361_v21 = vmul.f32 %v565_v0, %v348_v17  ;;  %v351_v22 = vmax.f32 %v333_v18, 0.0  ;;  %v328_v23 = vadd.f32 %v556_v61, %v327_v19  ;;  %654 = vmatprep.mubr.msk.f32.mxu0 %vm216_vm1, %v372_v15 }
 0x19e   :  { %v645_v24 = vpop.f32.mrf.mxu1  ;;  %655 = vmatmul.mubr.msk.f32.vlgmr.msra.gmra.mxu0 %vm216_vm1, %v373_v10 }
 0x19f   :  { %383 = vst.msk [vmem:[%s884_s8 + $0x18] sm:$0xff] %vm216_vm1, %v375_v20  ;;  %v374_v25 = vadd.f32 %v566_v4, %v361_v21  ;;  %v364_v26 = vmul.f32 %v565_v0, %v351_v22  ;;  %v350_v27 = vmax.f32 %v328_v23, 0.0  ;;  %v343_v28 = vadd.f32 %v645_v24, %v556_v61 }
 0x1a0   :  { %v337_v29 = vpop.f32.mrf.mxu1 }
 0x1a1   :  { %382 = vst.msk [vmem:[%s884_s8 + $0x10] sm:$0xff] %vm216_vm1, %v374_v25  ;;  %v377_v30 = vadd.f32 %v566_v4, %v364_v26  ;;  %v363_v31 = vmul.f32 %v565_v0, %v350_v27  ;;  %v353_v32 = vmax.f32 %v343_v28, 0.0  ;;  %v338_v33 = vadd.f32 %v556_v61, %v337_v29  ;;  %657 = vmatprep.mubr.msk.f32.mxu0 %vm216_vm1, %v374_v25 }
 0x1a2   :  { %658 = vmatmul.mubr.msk.f32.gmra.mxu0 %vm216_vm1, %v375_v20 }
 0x1a3   :  { %385 = vst.msk [vmem:[%s884_s8 + $0x28] sm:$0xff] %vm216_vm1, %v377_v30  ;;  %v376_v34 = vadd.f32 %v566_v4, %v363_v31  ;;  %v366_v35 = vmul.f32 %v565_v0, %v353_v32  ;;  %v352_v36 = vmax.f32 %v338_v33, 0.0 }
 0x1a5   :  { %384 = vst.msk [vmem:[%s884_s8 + $0x20] sm:$0xff] %vm216_vm1, %v376_v34  ;;  %v379_v37 = vadd.f32 %v566_v4, %v366_v35  ;;  %v365_v38 = vmul.f32 %v565_v0, %v352_v36  ;;  %660 = vmatprep.mubr.msk.f32.mxu0 %vm216_vm1, %v376_v34 }
 0x1a6   :  { %661 = vmatmul.mubr.msk.f32.gmra.mxu0 %vm216_vm1, %v377_v30 }
 0x1a7   :  { %387 = vst.msk [vmem:[%s884_s8 + $0x38] sm:$0xff] %vm216_vm1, %v379_v37  ;;  %v378_v39 = vadd.f32 %v566_v4, %v365_v38 }
 0x1a9   :  { %386 = vst.msk [vmem:[%s884_s8 + $0x30] sm:$0xff] %vm216_vm1, %v378_v39  ;;  %663 = vmatprep.mubr.msk.f32.mxu0 %vm216_vm1, %v378_v39 }
 0x1aa   :  { %664 = vmatmul.mubr.msk.f32.gmra.mxu0 %vm216_vm1, %v379_v37 }
 0x25e   :  { %v656_v41 = vpop.f32.mrf.mxu0 }
 0x25f   :  { %v495_v42 = vadd.f32 %v656_v41, %v567_v40 }
 0x260   :  { %v489_v43 = vpop.f32.mrf.mxu0 }
 0x261   :  { %530 = vst.msk [vmem:[%s886_s7 + $0x8] sm:$0xff] %vm528_vm2, %v495_v42  ;;  %v490_v44 = vadd.f32 %v567_v40, %v489_v43 }
 0x262   :  { %v659_v45 = vpop.f32.mrf.mxu0 }
 0x263   :  { %529 = vst.msk [vmem:[%s886_s7] sm:$0xff] %vm528_vm2, %v490_v44  ;;  %v505_v46 = vadd.f32 %v659_v45, %v567_v40 }
 0x264   :  { %v499_v47 = vpop.f32.mrf.mxu0 }
 0x265   :  { %532 = vst.msk [vmem:[%s886_s7 + $0x18] sm:$0xff] %vm528_vm2, %v505_v46  ;;  %v500_v48 = vadd.f32 %v567_v40, %v499_v47 }
 0x266   :  { %v662_v49 = vpop.f32.mrf.mxu0 }
 0x267   :  { %531 = vst.msk [vmem:[%s886_s7 + $0x10] sm:$0xff] %vm528_vm2, %v500_v48  ;;  %v515_v50 = vadd.f32 %v662_v49, %v567_v40 }
 0x268   :  { %v509_v51 = vpop.f32.mrf.mxu0 }
 0x269   :  { %534 = vst.msk [vmem:[%s886_s7 + $0x28] sm:$0xff] %vm528_vm2, %v515_v50  ;;  %v510_v52 = vadd.f32 %v567_v40, %v509_v51 }
 0x26a   :  { %v665_v53 = vpop.f32.mrf.mxu0 }
 0x26b   :  { %533 = vst.msk [vmem:[%s886_s7 + $0x20] sm:$0xff] %vm528_vm2, %v510_v52  ;;  %v525_v54 = vadd.f32 %v665_v53, %v567_v40 }
 0x26c   :  { %v519_v55 = vpop.f32.mrf.mxu0 }
 0x26d   :  { %536 = vst.msk [vmem:[%s886_s7 + $0x38] sm:$0xff] %vm528_vm2, %v525_v54  ;;  %v520_v56 = vadd.f32 %v567_v40, %v519_v55 }
 0x26f   :  { %535 = vst.msk [vmem:[%s886_s7 + $0x30] sm:$0xff] %vm528_vm2, %v520_v56 }

</bundles_post_ra>
